<compile_context>
chip_gen: v7x
topology: tpu7x:2x2x1
jax: 0.10.0
libtpu: 0.0.40
codegen_flags: <defaults>
</compile_context>

<pallas_src>
import jax
import jax.numpy as jnp
from jax.experimental import pallas as pl
from jax.experimental.pallas import tpu as pltpu


def _cdiv(a, b):
    return (a + b - 1) // b


def _blur3x3_kernel(x_ref, o_ref):
    # x_ref: (1, TH+2, W+2, TC)   halo'd, zero-padded input row group (channels-last)
    # o_ref: (TH,   W,   TC)      output rows for this (row-tile, channel-tile)
    th, w, _ = o_ref.shape
    # horizontal [1, 2, 1] pass (along the second-minor / sublane axis), f32 accumulation
    xl = x_ref[0, :, 0:w, :].astype(jnp.float32)
    xm = x_ref[0, :, 1:w + 1, :].astype(jnp.float32)
    xr = x_ref[0, :, 2:w + 2, :].astype(jnp.float32)
    hz = xl + (xm + xm) + xr                       # (TH+2, W, TC)
    # vertical [1, 2, 1] pass (along the leading axis)
    top = hz[0:th]
    mid = hz[1:th + 1]
    bot = hz[2:th + 2]
    out = top + (mid + mid) + bot                  # (TH, W, TC)
    o_ref[...] = (out * (1.0 / 16.0)).astype(o_ref.dtype)


def _choose_tiles(h, w, nc, itemsize):
    """Pick (row_tile, channel_tile) so double-buffered in/out blocks fit a VMEM budget."""
    lane = 128
    wp = w + 2
    budget = 24 * 1024 * 1024   # conservative vs. v7x 64 MiB physical / 32 MiB scoped default

    def step_bytes(th, tc):
        # input block (th+2, wp, tc) + output block (th, w, tc), double-buffered
        return 2 * ((th + 2) * wp + th * w) * tc * itemsize

    tc = nc if nc <= lane else lane
    th = h
    while th > 8 and step_bytes(th, tc) > budget:
        th = max(8, (th + 1) // 2)
    # fewer / fatter grid steps: grow the channel tile while headroom remains
    while nc > tc and tc < 512 and step_bytes(th, tc + lane) <= budget:
        tc += lane
    return th, tc


def blur(x, *, row_tile=None):
    """Depthwise 3x3 binomial blur with padding=1 (StyleGAN1 Blur.forward).

    x: (N, C, H, W) -> (N, C, H, W)
    """
    n, c, h, w = x.shape
    nc = n * c
    hp, wp = h + 2, w + 2
    itemsize = max(jnp.dtype(x.dtype).itemsize, 4)   # kernel accumulates in f32

    th, tc = _choose_tiles(h, w, nc, itemsize)
    if row_tile is not None:
        th = max(1, min(int(row_tile), h))
    num_h = _cdiv(h, th)
    ncp = _cdiv(nc, tc) * tc

    # zero padding (== F.conv2d(padding=1)); channels-last with N*C merged into the lane dim
    xp = jnp.pad(x, ((0, 0), (0, 0), (1, 1), (1, 1)))
    xt = jnp.transpose(xp, (2, 3, 0, 1)).reshape(hp, wp, nc)

    # pad rows so every row tile (incl. the last) has its 2 halo rows; pad the merged
    # channel axis up to a whole number of lane tiles (extra lanes are sliced off below)
    rows_needed = num_h * th + 2
    xt = jnp.pad(xt, ((0, rows_needed - hp), (0, 0), (0, ncp - nc)))

    # materialize overlapping row groups: group t covers padded rows [t*th, t*th + th + 2)
    xg = jnp.stack([xt[t * th: t * th + th + 2] for t in range(num_h)], axis=0)
    # xg: (num_h, th + 2, wp, ncp)

    out = pl.pallas_call(
        _blur3x3_kernel,
        out_shape=jax.ShapeDtypeStruct((num_h * th, w, ncp), x.dtype),
        grid=(num_h, ncp // tc),
        in_specs=[pl.BlockSpec((1, th + 2, wp, tc), lambda i, j: (i, 0, 0, j))],
        out_specs=pl.BlockSpec((th, w, tc), lambda i, j: (i, 0, j)),
        compiler_params=pltpu.CompilerParams(
            dimension_semantics=("parallel", "parallel"),
            vmem_limit_bytes=48 * 1024 * 1024),
    )(xg)

    y = out[:h, :, :nc].reshape(h, w, n, c)
    return jnp.transpose(y, (2, 3, 0, 1))


if __name__ == "__main__":
    key = jax.random.PRNGKey(0)
    N, C, H, W = 2, 4, 16, 16
    x = jax.random.normal(key, (N, C, H, W), jnp.float32)

    out = blur(x)
    out = jax.block_until_ready(out)

    # reference: depthwise (groups=C) 3x3 binomial blur, padding=1 — same as the module
    k = jnp.array([[1., 2., 1.], [2., 4., 2.], [1., 2., 1.]], jnp.float32)
    k = k / k.sum()
    wref = jnp.tile(k[None, None], (C, 1, 1, 1))   # (C, 1, 3, 3), OIHW with groups=C
    ref = jax.lax.conv_general_dilated(
        x, wref, window_strides=(1, 1), padding=[(1, 1), (1, 1)],
        dimension_numbers=("NCHW", "OIHW", "NCHW"),
        feature_group_count=C, precision=jax.lax.Precision.HIGHEST)

    assert out.shape == ref.shape, (out.shape, ref.shape)
    max_err = float(jnp.max(jnp.abs(out - ref)))
    assert jnp.allclose(out, ref, rtol=1e-5, atol=1e-5), max_err

    # also exercise the spatial (row-tile) path of the same kernel
    out_tiled = jax.block_until_ready(blur(x, row_tile=8))
    max_err_t = float(jnp.max(jnp.abs(out_tiled - ref)))
    assert jnp.allclose(out_tiled, ref, rtol=1e-5, atol=1e-5), max_err_t

    print("KERNEL_OK")
</pallas_src>

<mosaic_0001>
module attributes {stable_mosaic.version = 11 : i64} {
  func.func @_blur3x3_kernel(%arg0: i32, %arg1: i32, %arg2: memref<1x18x18x8xf32, #tpu.memory_space<vmem>>, %arg3: memref<16x16x8xf32, #tpu.memory_space<vmem>>) attributes {dimension_semantics = [#tpu.dimension_semantics<parallel>, #tpu.dimension_semantics<parallel>], iteration_bounds = array<i64: 1, 1>, scalar_prefetch = 0 : i64, scratch_operands = 0 : i64, tpu.core_type = #tpu.core_type<tc>, window_params = [{transform_indices = @transform_0, window_bounds = array<i64: 1, 18, 18, 8>}, {transform_indices = @transform_1, window_bounds = array<i64: 16, 16, 8>}]} {
    %c0 = arith.constant 0 : index
    %c0_0 = arith.constant 0 : index
    %c0_1 = arith.constant 0 : index
    %c0_2 = arith.constant 0 : index
    %0 = vector.load %arg2[%c0, %c0_0, %c0_1, %c0_2] : memref<1x18x18x8xf32, #tpu.memory_space<vmem>>, vector<1x18x16x8xf32>
    %1 = vector.shape_cast %0 : vector<1x18x16x8xf32> to vector<18x16x8xf32>
    %c0_3 = arith.constant 0 : index
    %c0_4 = arith.constant 0 : index
    %c1 = arith.constant 1 : index
    %c0_5 = arith.constant 0 : index
    %2 = vector.load %arg2[%c0_3, %c0_4, %c1, %c0_5] : memref<1x18x18x8xf32, #tpu.memory_space<vmem>>, vector<1x18x16x8xf32>
    %3 = vector.shape_cast %2 : vector<1x18x16x8xf32> to vector<18x16x8xf32>
    %c0_6 = arith.constant 0 : index
    %c0_7 = arith.constant 0 : index
    %c2 = arith.constant 2 : index
    %c0_8 = arith.constant 0 : index
    %4 = vector.load %arg2[%c0_6, %c0_7, %c2, %c0_8] : memref<1x18x18x8xf32, #tpu.memory_space<vmem>>, vector<1x18x16x8xf32>
    %5 = vector.shape_cast %4 : vector<1x18x16x8xf32> to vector<18x16x8xf32>
    %6 = arith.addf %3, %3 : vector<18x16x8xf32>
    %7 = arith.addf %1, %6 : vector<18x16x8xf32>
    %8 = arith.addf %7, %5 : vector<18x16x8xf32>
    %9 = vector.extract_strided_slice %8 {offsets = [0, 0, 0], sizes = [16, 16, 8], strides = [1, 1, 1]} : vector<18x16x8xf32> to vector<16x16x8xf32>
    %10 = vector.extract_strided_slice %8 {offsets = [1, 0, 0], sizes = [16, 16, 8], strides = [1, 1, 1]} : vector<18x16x8xf32> to vector<16x16x8xf32>
    %11 = vector.extract_strided_slice %8 {offsets = [2, 0, 0], sizes = [16, 16, 8], strides = [1, 1, 1]} : vector<18x16x8xf32> to vector<16x16x8xf32>
    %12 = arith.addf %10, %10 : vector<16x16x8xf32>
    %13 = arith.addf %9, %12 : vector<16x16x8xf32>
    %14 = arith.addf %13, %11 : vector<16x16x8xf32>
    %cst = arith.constant 6.250000e-02 : f32
    %15 = vector.broadcast %cst : f32 to vector<16x16x8xf32>
    %16 = arith.mulf %14, %15 : vector<16x16x8xf32>
    %c0_9 = arith.constant 0 : index
    %c0_10 = arith.constant 0 : index
    %c0_11 = arith.constant 0 : index
    %17 = vector.load %arg3[%c0_9, %c0_10, %c0_11] : memref<16x16x8xf32, #tpu.memory_space<vmem>>, vector<16x16x8xf32>
    tpu.vector_store %arg3[%c0_9, %c0_10, %c0_11], %16 {strides = array<i32>} : memref<16x16x8xf32, #tpu.memory_space<vmem>>, vector<16x16x8xf32>,
    return
  }
  func.func @transform_0(%arg0: i32, %arg1: i32) -> (i32, i32, i32, i32) {
    %c0_i32 = arith.constant 0 : i32
    %c0_i32_0 = arith.constant 0 : i32
    %c0_i32_1 = arith.constant 0 : i32
    return %arg0, %c0_i32, %c0_i32_0, %arg1 : i32, i32, i32, i32
  }
  func.func @transform_1(%arg0: i32, %arg1: i32) -> (i32, i32, i32) {
    %c0_i32 = arith.constant 0 : i32
    %c0_i32_0 = arith.constant 0 : i32
    return %arg0, %c0_i32, %arg1 : i32, i32, i32
  }
}

</mosaic_0001>

<bundles_post_ra>
// kernel: tpu_custom_call.1
= control target key start
LH: loop header
LB: loop body
LE: loop exit
PB: predicated region body
PF: predicated region fallthrough
CT: control target
= control target key end

     0   :  { %vm352_vm0 = vcmask 64512   ;;  %s881_s0 = inlined_call_operand.vmem [shape: f32[1,18,18,8], index: 0, kind: input, shape index: {}]   ;;  %s882_s1 = inlined_call_operand.vmem [shape: f32[16,16,8], index: 1, kind: output, shape index: {}]  }
   0x1   :  { %v8_v0 = vld [vmem:[%s881_s0] sm:$0xff]  ;;  %v10_v1 = vld [vmem:[%s881_s0 + $0x18] sm:$0xff]  ;;  %v12_v2 = vld [vmem:[%s881_s0 + $0x30] sm:$0xff] }
   0x2   :  { %v44_v3 = vld [vmem:[%s881_s0 + $0x1] sm:$0xff]  ;;  %v46_v4 = vld [vmem:[%s881_s0 + $0x19] sm:$0xff]  ;;  %v48_v5 = vld [vmem:[%s881_s0 + $0x31] sm:$0xff] }
   0x3   :  { %v80_v6 = vld [vmem:[%s881_s0 + $0x2] sm:$0xff]  ;;  %v82_v7 = vld [vmem:[%s881_s0 + $0x1a] sm:$0xff]  ;;  %v84_v8 = vld [vmem:[%s881_s0 + $0x32] sm:$0xff]  ;;  %v116_v9 = vadd.f32 %v44_v3, %v44_v3  ;;  %v118_v10 = vadd.f32 %v46_v4, %v46_v4  ;;  %v120_v11 = vadd.f32 %v48_v5, %v48_v5 }
   0x4   :  { %v9_v12 = vld [vmem:[%s881_s0 + $0x8] sm:$0xff]  ;;  %v11_v13 = vld [vmem:[%s881_s0 + $0x20] sm:$0xff]  ;;  %v13_v14 = vld [vmem:[%s881_s0 + $0x38] sm:$0xff] }
   0x5   :  { %v152_v15 = vadd.f32 %v116_v9, %v8_v0  ;;  %v154_v16 = vadd.f32 %v118_v10, %v10_v1  ;;  %v156_v17 = vadd.f32 %v120_v11, %v12_v2  ;;  %v45_v18 = vld [vmem:[%s881_s0 + $0x9] sm:$0xff]  ;;  %v47_v19 = vld [vmem:[%s881_s0 + $0x21] sm:$0xff]  ;;  %v49_v20 = vld [vmem:[%s881_s0 + $0x39] sm:$0xff] }
   0x6   :  { %v81_v21 = vld [vmem:[%s881_s0 + $0xa] sm:$0xff]  ;;  %v83_v22 = vld [vmem:[%s881_s0 + $0x22] sm:$0xff]  ;;  %v117_v23 = vadd.f32 %v45_v18, %v45_v18  ;;  %v119_v24 = vadd.f32 %v47_v19, %v47_v19  ;;  %v121_v25 = vadd.f32 %v49_v20, %v49_v20  ;;  %v85_v29 = vld [vmem:[%s881_s0 + $0x3a] sm:$0xff] }
   0x7   :  { %v188_v26 = vadd.f32 %v152_v15, %v80_v6  ;;  %v190_v27 = vadd.f32 %v154_v16, %v82_v7  ;;  %v192_v28 = vadd.f32 %v156_v17, %v84_v8  ;;  %v14_v30 = vld [vmem:[%s881_s0 + $0x48] sm:$0xff]  ;;  %v15_v36 = vld [vmem:[%s881_s0 + $0x50] sm:$0xff]  ;;  %v16_v48 = vld [vmem:[%s881_s0 + $0x60] sm:$0xff] }
   0x8   :  { %v50_v31 = vld [vmem:[%s881_s0 + $0x49] sm:$0xff]  ;;  %v153_v32 = vadd.f32 %v117_v23, %v9_v12  ;;  %v155_v33 = vadd.f32 %v119_v24, %v11_v13  ;;  %v157_v34 = vadd.f32 %v121_v25, %v13_v14  ;;  %v51_v37 = vld [vmem:[%s881_s0 + $0x51] sm:$0xff]  ;;  %v52_v42 = vld [vmem:[%s881_s0 + $0x61] sm:$0xff] }
   0x9   :  { %v122_v35 = vadd.f32 %v50_v31, %v50_v31  ;;  %v224_v38 = vadd.f32 %v190_v27, %v190_v27  ;;  %v86_v39 = vld [vmem:[%s881_s0 + $0x4a] sm:$0xff]  ;;  %v226_v40 = vadd.f32 %v192_v28, %v192_v28  ;;  %v123_v41 = vadd.f32 %v51_v37, %v51_v37  ;;  %v87_v47 = vld [vmem:[%s881_s0 + $0x52] sm:$0xff]  ;;  %v88_v58 = vld [vmem:[%s881_s0 + $0x62] sm:$0xff] }
   0xa   :  { %v189_v43 = vadd.f32 %v153_v32, %v81_v21  ;;  %v191_v44 = vadd.f32 %v155_v33, %v83_v22  ;;  %v193_v45 = vadd.f32 %v157_v34, %v85_v29  ;;  %v53_v49 = vld [vmem:[%s881_s0 + $0x69] sm:$0xff]  ;;  %v124_v53 = vadd.f32 %v52_v42, %v52_v42  ;;  %v54_v54 = vld [vmem:[%s881_s0 + $0x79] sm:$0xff]  ;;  %v55_v11 = vld [vmem:[%s881_s0 + $0x81] sm:$0xff] }
   0xb   :  { %v158_v46 = vadd.f32 %v122_v35, %v14_v30  ;;  %v256_v50 = vadd.f32 %v224_v38, %v188_v26  ;;  %v258_v51 = vadd.f32 %v226_v40, %v190_v27  ;;  %v159_v52 = vadd.f32 %v123_v41, %v15_v36  ;;  %v17_v59 = vld [vmem:[%s881_s0 + $0x68] sm:$0xff]  ;;  %v18_v6 = vld [vmem:[%s881_s0 + $0x78] sm:$0xff]  ;;  %v19_v21 = vld [vmem:[%s881_s0 + $0x80] sm:$0xff] }
   0xc   :  { %v225_v55 = vadd.f32 %v191_v44, %v191_v44  ;;  %v227_v57 = vadd.f32 %v193_v45, %v193_v45  ;;  %v125_v60 = vadd.f32 %v53_v49, %v53_v49  ;;  %v160_v63 = vadd.f32 %v124_v53, %v16_v48  ;;  %v89_v5 = vld [vmem:[%s881_s0 + $0x6a] sm:$0xff]  ;;  %v90_v16 = vld [vmem:[%s881_s0 + $0x7a] sm:$0xff]  ;;  %v91_v27 = vld [vmem:[%s881_s0 + $0x82] sm:$0xff] }
   0xd   :  { %v194_v56 = vadd.f32 %v158_v46, %v86_v39  ;;  %v288_v61 = vadd.f32 %v256_v50, %v192_v28  ;;  %v195_v62 = vadd.f32 %v159_v52, %v87_v47  ;;  %v126_v0 = vadd.f32 %v54_v54, %v54_v54  ;;  %v56_v22 = vld [vmem:[%s881_s0 + $0x91] sm:$0xff]  ;;  %v57_v23 = vld [vmem:[%s881_s0 + $0x99] sm:$0xff]  ;;  %v58_v35 = vld [vmem:[%s881_s0 + $0xa9] sm:$0xff] }
   0xe   :  { %v257_v1 = vadd.f32 %v225_v55, %v189_v43  ;;  %v259_v3 = vadd.f32 %v227_v57, %v191_v44  ;;  %v196_v8 = vadd.f32 %v160_v63, %v88_v58  ;;  %v161_v9 = vadd.f32 %v125_v60, %v17_v59  ;;  %v20_v33 = vld [vmem:[%s881_s0 + $0x90] sm:$0xff]  ;;  %v21_v34 = vld [vmem:[%s881_s0 + $0x98] sm:$0xff]  ;;  %v60_v41 = vld [vmem:[%s881_s0 + $0xc1] sm:$0xff] }
   0xf   :  { %v290_v2 = vadd.f32 %v258_v51, %v194_v56  ;;  %v228_v4 = vadd.f32 %v194_v56, %v194_v56  ;;  %v320_v7 = vmul.f32 0.0625, %v288_v61  ;;  %v229_v10 = vadd.f32 %v195_v62, %v195_v62  ;;  %v59_v40 = vld [vmem:[%s881_s0 + $0xb1] sm:$0xff]  ;;  %v93_v47 = vld [vmem:[%s881_s0 + $0x9a] sm:$0xff]  ;;  %v22_v48 = vld [vmem:[%s881_s0 + $0xa8] sm:$0xff] }
  0x10   :  { %v289_v12 = vadd.f32 %v257_v1, %v193_v45  ;;  %v291_v14 = vadd.f32 %v259_v3, %v195_v62  ;;  %v505_v17 = vadd.f32 %v161_v9, %v89_v5  ;;  %v162_v19 = vadd.f32 %v126_v0, %v18_v6  ;;  %v23_v53 = vld [vmem:[%s881_s0 + $0xb0] sm:$0xff]  ;;  %v24_v54 = vld [vmem:[%s881_s0 + $0xc0] sm:$0xff]  ;;  %v25_v6 = vld [vmem:[%s881_s0 + $0xc8] sm:$0xff] }
  0x11   :  { %v322_v13 = vmul.f32 0.0625, %v290_v2  ;;  %v260_v15 = vadd.f32 %v228_v4, %v192_v28  ;;  %353 = vst.msk [vmem:[%s882_s1] sm:$0xff] %vm352_vm0, %v320_v7  ;;  %v261_v18 = vadd.f32 %v229_v10, %v193_v45  ;;  %v230_v20 = vadd.f32 %v196_v8, %v196_v8  ;;  %v92_v45 = vld [vmem:[%s881_s0 + $0x92] sm:$0xff]  ;;  %v61_v55 = vld [vmem:[%s881_s0 + $0xc9] sm:$0xff] }
  0x12   :  { %v321_v24 = vmul.f32 0.0625, %v289_v12  ;;  %v323_v25 = vmul.f32 0.0625, %v291_v14  ;;  %v127_v28 = vadd.f32 %v55_v11, %v55_v11  ;;  %v198_v30 = vadd.f32 %v162_v19, %v90_v16  ;;  %v94_v0 = vld [vmem:[%s881_s0 + $0xaa] sm:$0xff]  ;;  %v95_v1 = vld [vmem:[%s881_s0 + $0xb2] sm:$0xff]  ;;  %v96_v2 = vld [vmem:[%s881_s0 + $0xc2] sm:$0xff] }
  0x13   :  { %355 = vst.msk [vmem:[%s882_s1 + $0x10] sm:$0xff] %vm352_vm0, %v322_v13  ;;  %v292_v26 = vadd.f32 %v260_v15, %v196_v8  ;;  %v293_v29 = vadd.f32 %v261_v18, %v505_v17  ;;  %v262_v31 = vadd.f32 %v230_v20, %v194_v56  ;;  %v231_v32 = vadd.f32 %v505_v17, %v505_v17  ;;  %v62_v12 = vld [vmem:[%s881_s0 + $0xd9] sm:$0xff]  ;;  %v97_v18 = vld [vmem:[%s881_s0 + $0xca] sm:$0xff] }
  0x14   :  { %354 = vst.msk [vmem:[%s882_s1 + $0x8] sm:$0xff] %vm352_vm0, %v321_v24  ;;  %356 = vst.msk [vmem:[%s882_s1 + $0x18] sm:$0xff] %vm352_vm0, %v323_v25  ;;  %v163_v37 = vadd.f32 %v127_v28, %v19_v21  ;;  %v128_v38 = vadd.f32 %v56_v22, %v56_v22  ;;  %v129_v39 = vadd.f32 %v57_v23, %v57_v23  ;;  %v26_v22 = vld [vmem:[%s881_s0 + $0xd8] sm:$0xff] }
  0x15   :  { %v324_v36 = vmul.f32 0.0625, %v292_v26  ;;  %v325_v42 = vmul.f32 0.0625, %v293_v29  ;;  %v294_v43 = vadd.f32 %v262_v31, %v198_v30  ;;  %v263_v44 = vadd.f32 %v231_v32, %v195_v62  ;;  %v98_v31 = vld [vmem:[%s881_s0 + $0xda] sm:$0xff] }
  0x16   :  { %v232_v46 = vadd.f32 %v198_v30, %v198_v30  ;;  %v199_v49 = vadd.f32 %v163_v37, %v91_v27  ;;  %v164_v50 = vadd.f32 %v128_v38, %v20_v33  ;;  %v165_v51 = vadd.f32 %v129_v39, %v21_v34  ;;  %v63_v27 = vld [vmem:[%s881_s0 + $0xe1] sm:$0xff]  ;;  %v64_v38 = vld [vmem:[%s881_s0 + $0xf1] sm:$0xff]  ;;  %v65_v39 = vld [vmem:[%s881_s0 + $0xf9] sm:$0xff] }
  0x17   :  { %357 = vst.msk [vmem:[%s882_s1 + $0x20] sm:$0xff] %vm352_vm0, %v324_v36  ;;  %v130_v52 = vadd.f32 %v58_v35, %v58_v35  ;;  %358 = vst.msk [vmem:[%s882_s1 + $0x28] sm:$0xff] %vm352_vm0, %v325_v42  ;;  %v326_v56 = vmul.f32 0.0625, %v294_v43  ;;  %v131_v58 = vadd.f32 %v59_v40, %v59_v40  ;;  %v132_v59 = vadd.f32 %v60_v41, %v60_v41  ;;  %v27_v37 = vld [vmem:[%s881_s0 + $0xe0] sm:$0xff] }
  0x18   :  { %v264_v57 = vadd.f32 %v232_v46, %v196_v8  ;;  %v295_v60 = vadd.f32 %v263_v44, %v199_v49  ;;  %v200_v61 = vadd.f32 %v164_v50, %v92_v45  ;;  %v201_v62 = vadd.f32 %v165_v51, %v93_v47  ;;  %v99_v42 = vld [vmem:[%s881_s0 + $0xe2] sm:$0xff]  ;;  %v29_v50 = vld [vmem:[%s881_s0 + $0xf8] sm:$0xff] }
  0x19   :  { %v233_v63 = vadd.f32 %v199_v49, %v199_v49  ;;  %359 = vst.msk [vmem:[%s882_s1 + $0x30] sm:$0xff] %vm352_vm0, %v326_v56  ;;  %v166_v3 = vadd.f32 %v130_v52, %v22_v48  ;;  %v167_v4 = vadd.f32 %v131_v58, %v23_v53  ;;  %v168_v5 = vadd.f32 %v132_v59, %v24_v54  ;;  %v66_v51 = vld [vmem:[%s881_s0 + $0x109] sm:$0xff]  ;;  %v67_v56 = vld [vmem:[%s881_s0 + $0x111] sm:$0xff] }
  0x1a   :  { %v133_v7 = vadd.f32 %v61_v55, %v61_v55  ;;  %v327_v8 = vmul.f32 0.0625, %v295_v60  ;;  %v296_v9 = vadd.f32 %v264_v57, %v200_v61  ;;  %v234_v11 = vadd.f32 %v200_v61, %v200_v61  ;;  %v68_v57 = vld [vmem:[%s881_s0 + $0x121] sm:$0xff] }
  0x1b   :  { %v265_v10 = vadd.f32 %v233_v63, %v505_v17  ;;  %v202_v13 = vadd.f32 %v166_v3, %v94_v0  ;;  %v203_v14 = vadd.f32 %v167_v4, %v95_v1  ;;  %v235_v15 = vadd.f32 %v201_v62, %v201_v62  ;;  %v101_v63 = vld [vmem:[%s881_s0 + $0xfa] sm:$0xff]  ;;  %v30_v0 = vld [vmem:[%s881_s0 + $0x108] sm:$0xff] }
  0x1c   :  { %v595_v16 = vadd.f32 %v168_v5, %v96_v2  ;;  %360 = vst.msk [vmem:[%s882_s1 + $0x38] sm:$0xff] %vm352_vm0, %v327_v8  ;;  %v328_v17 = vmul.f32 0.0625, %v296_v9  ;;  %v266_v20 = vadd.f32 %v234_v11, %v198_v30  ;;  %v169_v21 = vadd.f32 %v133_v7, %v25_v6  ;;  %v31_v5 = vld [vmem:[%s881_s0 + $0x110] sm:$0xff]  ;;  %v32_v6 = vld [vmem:[%s881_s0 + $0x120] sm:$0xff] }
  0x1d   :  { %v297_v19 = vadd.f32 %v265_v10, %v201_v62  ;;  %v267_v23 = vadd.f32 %v235_v15, %v199_v49  ;;  %v236_v24 = vadd.f32 %v202_v13, %v202_v13  ;;  %v237_v25 = vadd.f32 %v203_v14, %v203_v14  ;;  %v28_v49 = vld [vmem:[%s881_s0 + $0xf0] sm:$0xff] }
  0x1e   :  { %v134_v26 = vadd.f32 %v62_v12, %v62_v12  ;;  %361 = vst.msk [vmem:[%s882_s1 + $0x40] sm:$0xff] %vm352_vm0, %v328_v17  ;;  %v298_v29 = vadd.f32 %v266_v20, %v202_v13  ;;  %v614_v30 = vadd.f32 %v169_v21, %v97_v18  ;;  %v238_v32 = vadd.f32 %v595_v16, %v595_v16  ;;  %v69_v7 = vld [vmem:[%s881_s0 + $0x129] sm:$0xff]  ;;  %v103_v17 = vld [vmem:[%s881_s0 + $0x112] sm:$0xff] }
  0x1f   :  { %v329_v28 = vmul.f32 0.0625, %v297_v19  ;;  %v299_v33 = vadd.f32 %v267_v23, %v203_v14  ;;  %v268_v34 = vadd.f32 %v236_v24, %v200_v61  ;;  %v269_v35 = vadd.f32 %v237_v25, %v201_v62  ;;  %v100_v61 = vld [vmem:[%s881_s0 + $0xf2] sm:$0xff]  ;;  %v102_v18 = vld [vmem:[%s881_s0 + $0x10a] sm:$0xff]  ;;  %v104_v19 = vld [vmem:[%s881_s0 + $0x122] sm:$0xff] }
  0x20   :  { %v170_v36 = vadd.f32 %v134_v26, %v26_v22  ;;  %v330_v40 = vmul.f32 0.0625, %v298_v29  ;;  %v270_v41 = vadd.f32 %v238_v32, %v202_v13  ;;  %v135_v43 = vadd.f32 %v63_v27, %v63_v27  ;;  %v33_v22 = vld [vmem:[%s881_s0 + $0x128] sm:$0xff] }
  0x21   :  { %362 = vst.msk [vmem:[%s882_s1 + $0x48] sm:$0xff] %vm352_vm0, %v329_v28  ;;  %v239_v44 = vadd.f32 %v614_v30, %v614_v30  ;;  %v331_v45 = vmul.f32 0.0625, %v299_v33  ;;  %v300_v46 = vadd.f32 %v268_v34, %v595_v16  ;;  %v301_v47 = vadd.f32 %v269_v35, %v614_v30  ;;  %v70_v28 = vld [vmem:[%s881_s0 + $0x139] sm:$0xff]  ;;  %v105_v34 = vld [vmem:[%s881_s0 + $0x12a] sm:$0xff] }
  0x22   :  { %v206_v48 = vadd.f32 %v170_v36, %v98_v31  ;;  %363 = vst.msk [vmem:[%s882_s1 + $0x50] sm:$0xff] %vm352_vm0, %v330_v40  ;;  %v171_v52 = vadd.f32 %v135_v43, %v27_v37  ;;  %v136_v54 = vadd.f32 %v64_v38, %v64_v38  ;;  %v137_v55 = vadd.f32 %v65_v39, %v65_v39  ;;  %v34_v38 = vld [vmem:[%s881_s0 + $0x138] sm:$0xff]  ;;  %v71_v43 = vld [vmem:[%s881_s0 + $0x141] sm:$0xff] }
  0x23   :  { %v271_v53 = vadd.f32 %v239_v44, %v203_v14  ;;  %364 = vst.msk [vmem:[%s882_s1 + $0x58] sm:$0xff] %vm352_vm0, %v331_v45  ;;  %v332_v58 = vmul.f32 0.0625, %v300_v46  ;;  %v333_v59 = vmul.f32 0.0625, %v301_v47  ;;  %v138_v4 = vadd.f32 %v66_v51, %v66_v51  ;;  %v106_v47 = vld [vmem:[%s881_s0 + $0x13a] sm:$0xff] }
  0x24   :  { %v302_v60 = vadd.f32 %v270_v41, %v206_v48  ;;  %v240_v62 = vadd.f32 %v206_v48, %v206_v48  ;;  %v207_v1 = vadd.f32 %v171_v52, %v99_v42  ;;  %v172_v2 = vadd.f32 %v136_v54, %v28_v49  ;;  %v72_v54 = vld [vmem:[%s881_s0 + $0x151] sm:$0xff] }
  0x25   :  { %v173_v3 = vadd.f32 %v137_v55, %v29_v50  ;;  %365 = vst.msk [vmem:[%s882_s1 + $0x60] sm:$0xff] %vm352_vm0, %v332_v58  ;;  %366 = vst.msk [vmem:[%s882_s1 + $0x68] sm:$0xff] %vm352_vm0, %v333_v59  ;;  %v139_v10 = vadd.f32 %v67_v56, %v67_v56  ;;  %v140_v11 = vadd.f32 %v68_v57, %v68_v57  ;;  %v73_v55 = vld [vmem:[%s881_s0 + $0x159] sm:$0xff]  ;;  %v107_v58 = vld [vmem:[%s881_s0 + $0x142] sm:$0xff] }
  0x26   :  { %v334_v8 = vmul.f32 0.0625, %v302_v60  ;;  %v272_v9 = vadd.f32 %v240_v62, %v595_v16  ;;  %v303_v12 = vadd.f32 %v271_v53, %v207_v1  ;;  %v208_v13 = vadd.f32 %v172_v2, %v100_v61  ;;  %v35_v53 = vld [vmem:[%s881_s0 + $0x140] sm:$0xff]  ;;  %v37_v2 = vld [vmem:[%s881_s0 + $0x158] sm:$0xff] }
  0x27   :  { %v209_v14 = vadd.f32 %v173_v3, %v101_v63  ;;  %v241_v15 = vadd.f32 %v207_v1, %v207_v1  ;;  %v174_v16 = vadd.f32 %v138_v4, %v30_v0  ;;  %v175_v20 = vadd.f32 %v139_v10, %v31_v5  ;;  %v74_v3 = vld [vmem:[%s881_s0 + $0x169] sm:$0xff] }
  0x28   :  { %367 = vst.msk [vmem:[%s882_s1 + $0x70] sm:$0xff] %vm352_vm0, %v334_v8  ;;  %v176_v21 = vadd.f32 %v140_v11, %v32_v6  ;;  %v141_v23 = vadd.f32 %v69_v7, %v69_v7  ;;  %v335_v24 = vmul.f32 0.0625, %v303_v12  ;;  %v304_v25 = vadd.f32 %v272_v9, %v208_v13  ;;  %v75_v8 = vld [vmem:[%s881_s0 + $0x171] sm:$0xff]  ;;  %v76_v9 = vld [vmem:[%s881_s0 + $0x181] sm:$0xff] }
  0x29   :  { %v273_v26 = vadd.f32 %v241_v15, %v614_v30  ;;  %v242_v27 = vadd.f32 %v208_v13, %v208_v13  ;;  %v210_v29 = vadd.f32 %v174_v16, %v102_v18  ;;  %v211_v31 = vadd.f32 %v175_v20, %v103_v17  ;;  %v109_v15 = vld [vmem:[%s881_s0 + $0x15a] sm:$0xff]  ;;  %v38_v18 = vld [vmem:[%s881_s0 + $0x168] sm:$0xff] }
  0x2a   :  { %v243_v32 = vadd.f32 %v209_v14, %v209_v14  ;;  %v711_v33 = vadd.f32 %v176_v21, %v104_v19  ;;  %368 = vst.msk [vmem:[%s882_s1 + $0x78] sm:$0xff] %vm352_vm0, %v335_v24  ;;  %v336_v30 = vmul.f32 0.0625, %v304_v25  ;;  %v177_v37 = vadd.f32 %v141_v23, %v33_v22  ;;  %v39_v21 = vld [vmem:[%s881_s0 + $0x170] sm:$0xff]  ;;  %v40_v22 = vld [vmem:[%s881_s0 + $0x180] sm:$0xff] }
  0x2b   :  { %v305_v35 = vadd.f32 %v273_v26, %v209_v14  ;;  %v274_v36 = vadd.f32 %v242_v27, %v206_v48  ;;  %v244_v40 = vadd.f32 %v210_v29, %v210_v29  ;;  %v245_v41 = vadd.f32 %v211_v31, %v211_v31  ;;  %v77_v23 = vld [vmem:[%s881_s0 + $0x189] sm:$0xff] }
  0x2c   :  { %v275_v39 = vadd.f32 %v243_v32, %v207_v1  ;;  %v142_v42 = vadd.f32 %v70_v28, %v70_v28  ;;  %369 = vst.msk [vmem:[%s882_s1 + $0x80] sm:$0xff] %vm352_vm0, %v336_v30  ;;  %v730_v46 = vadd.f32 %v177_v37, %v105_v34  ;;  %v246_v48 = vadd.f32 %v711_v33, %v711_v33  ;;  %v36_v1 = vld [vmem:[%s881_s0 + $0x150] sm:$0xff] }
  0x2d   :  { %v337_v44 = vmul.f32 0.0625, %v305_v35  ;;  %v306_v45 = vadd.f32 %v274_v36, %v210_v29  ;;  %v276_v50 = vadd.f32 %v244_v40, %v208_v13  ;;  %v277_v51 = vadd.f32 %v245_v41, %v209_v14  ;;  %v108_v13 = vld [vmem:[%s881_s0 + $0x152] sm:$0xff]  ;;  %v110_v34 = vld [vmem:[%s881_s0 + $0x16a] sm:$0xff]  ;;  %v112_v35 = vld [vmem:[%s881_s0 + $0x182] sm:$0xff] }
  0x2e   :  { %v307_v49 = vadd.f32 %v275_v39, %v211_v31  ;;  %v178_v52 = vadd.f32 %v142_v42, %v34_v38  ;;  %v278_v57 = vadd.f32 %v246_v48, %v210_v29  ;;  %v143_v59 = vadd.f32 %v71_v43, %v71_v43  ;;  %v111_v30 = vld [vmem:[%s881_s0 + $0x172] sm:$0xff]  ;;  %v41_v38 = vld [vmem:[%s881_s0 + $0x188] sm:$0xff] }
  0x2f   :  { %370 = vst.msk [vmem:[%s882_s1 + $0x88] sm:$0xff] %vm352_vm0, %v337_v44  ;;  %v338_v56 = vmul.f32 0.0625, %v306_v45  ;;  %v247_v60 = vadd.f32 %v730_v46, %v730_v46  ;;  %v308_v62 = vadd.f32 %v276_v50, %v711_v33  ;;  %v309_v63 = vadd.f32 %v277_v51, %v730_v46  ;;  %v78_v44 = vld [vmem:[%s881_s0 + $0x199] sm:$0xff]  ;;  %v113_v50 = vld [vmem:[%s881_s0 + $0x18a] sm:$0xff] }
  0x30   :  { %v339_v61 = vmul.f32 0.0625, %v307_v49  ;;  %v214_v0 = vadd.f32 %v178_v52, %v106_v47  ;;  %v179_v4 = vadd.f32 %v143_v59, %v35_v53  ;;  %v144_v6 = vadd.f32 %v72_v54, %v72_v54  ;;  %v42_v54 = vld [vmem:[%s881_s0 + $0x198] sm:$0xff]  ;;  %v79_v59 = vld [vmem:[%s881_s0 + $0x1a1] sm:$0xff] }
  0x31   :  { %371 = vst.msk [vmem:[%s882_s1 + $0x90] sm:$0xff] %vm352_vm0, %v338_v56  ;;  %v279_v5 = vadd.f32 %v247_v60, %v211_v31  ;;  %v145_v7 = vadd.f32 %v73_v55, %v73_v55  ;;  %v340_v10 = vmul.f32 0.0625, %v308_v62  ;;  %v341_v11 = vmul.f32 0.0625, %v309_v63  ;;  %v114_v63 = vld [vmem:[%s881_s0 + $0x19a] sm:$0xff] }
  0x32   :  { %372 = vst.msk [vmem:[%s882_s1 + $0x98] sm:$0xff] %vm352_vm0, %v339_v61  ;;  %v310_v12 = vadd.f32 %v278_v57, %v214_v0  ;;  %v248_v14 = vadd.f32 %v214_v0, %v214_v0  ;;  %v215_v17 = vadd.f32 %v179_v4, %v107_v58  ;;  %v180_v19 = vadd.f32 %v144_v6, %v36_v1 }
  0x33   :  { %v181_v16 = vadd.f32 %v145_v7, %v37_v2  ;;  %v146_v20 = vadd.f32 %v74_v3, %v74_v3  ;;  %373 = vst.msk [vmem:[%s882_s1 + $0xa0] sm:$0xff] %vm352_vm0, %v340_v10  ;;  %374 = vst.msk [vmem:[%s882_s1 + $0xa8] sm:$0xff] %vm352_vm0, %v341_v11  ;;  %v147_v26 = vadd.f32 %v75_v8, %v75_v8 }
  0x34   :  { %v342_v24 = vmul.f32 0.0625, %v310_v12  ;;  %v280_v25 = vadd.f32 %v248_v14, %v711_v33  ;;  %v148_v27 = vadd.f32 %v76_v9, %v76_v9  ;;  %v311_v28 = vadd.f32 %v279_v5, %v215_v17  ;;  %v43_v5 = vld [vmem:[%s881_s0 + $0x1a0] sm:$0xff] }
  0x35   :  { %v216_v29 = vadd.f32 %v180_v19, %v108_v13  ;;  %v217_v31 = vadd.f32 %v181_v16, %v109_v15  ;;  %v249_v32 = vadd.f32 %v215_v17, %v215_v17  ;;  %v182_v33 = vadd.f32 %v146_v20, %v38_v18  ;;  %v115_v14 = vld [vmem:[%s881_s0 + $0x1a2] sm:$0xff] }
  0x36   :  { %375 = vst.msk [vmem:[%s882_s1 + $0xb0] sm:$0xff] %vm352_vm0, %v342_v24  ;;  %v183_v36 = vadd.f32 %v147_v26, %v39_v21  ;;  %v184_v37 = vadd.f32 %v148_v27, %v40_v22  ;;  %v149_v39 = vadd.f32 %v77_v23, %v77_v23  ;;  %v343_v40 = vmul.f32 0.0625, %v311_v28 }
  0x37   :  { %v312_v41 = vadd.f32 %v280_v25, %v216_v29  ;;  %v281_v42 = vadd.f32 %v249_v32, %v730_v46  ;;  %v250_v43 = vadd.f32 %v216_v29, %v216_v29  ;;  %v218_v45 = vadd.f32 %v182_v33, %v110_v34 }
  0x38   :  { %v219_v47 = vadd.f32 %v183_v36, %v111_v30  ;;  %v251_v48 = vadd.f32 %v217_v31, %v217_v31  ;;  %v220_v49 = vadd.f32 %v184_v37, %v112_v35  ;;  %376 = vst.msk [vmem:[%s882_s1 + $0xb8] sm:$0xff] %vm352_vm0, %v343_v40  ;;  %v185_v53 = vadd.f32 %v149_v39, %v41_v38 }
  0x39   :  { %v344_v51 = vmul.f32 0.0625, %v312_v41  ;;  %v313_v46 = vadd.f32 %v281_v42, %v217_v31  ;;  %v282_v52 = vadd.f32 %v250_v43, %v214_v0  ;;  %v252_v56 = vadd.f32 %v218_v45, %v218_v45 }
  0x3a   :  { %v283_v55 = vadd.f32 %v251_v48, %v215_v17  ;;  %v253_v57 = vadd.f32 %v219_v47, %v219_v47  ;;  %v150_v58 = vadd.f32 %v78_v44, %v78_v44  ;;  %v221_v62 = vadd.f32 %v185_v53, %v113_v50 }
  0x3b   :  { %377 = vst.msk [vmem:[%s882_s1 + $0xc0] sm:$0xff] %vm352_vm0, %v344_v51  ;;  %v345_v60 = vmul.f32 0.0625, %v313_v46  ;;  %v314_v61 = vadd.f32 %v282_v52, %v218_v45  ;;  %v254_v0 = vadd.f32 %v220_v49, %v220_v49  ;;  %v284_v2 = vadd.f32 %v252_v56, %v216_v29 }
  0x3c   :  { %v315_v1 = vadd.f32 %v283_v55, %v219_v47  ;;  %v285_v3 = vadd.f32 %v253_v57, %v217_v31  ;;  %v186_v4 = vadd.f32 %v150_v58, %v42_v54  ;;  %v151_v8 = vadd.f32 %v79_v59, %v79_v59 }
  0x3d   :  { %378 = vst.msk [vmem:[%s882_s1 + $0xc8] sm:$0xff] %vm352_vm0, %v345_v60  ;;  %v346_v6 = vmul.f32 0.0625, %v314_v61  ;;  %v286_v7 = vadd.f32 %v254_v0, %v218_v45  ;;  %v255_v9 = vadd.f32 %v221_v62, %v221_v62  ;;  %v316_v11 = vadd.f32 %v284_v2, %v220_v49 }
  0x3e   :  { %v347_v10 = vmul.f32 0.0625, %v315_v1  ;;  %v317_v12 = vadd.f32 %v285_v3, %v221_v62  ;;  %v222_v13 = vadd.f32 %v186_v4, %v114_v63  ;;  %v187_v15 = vadd.f32 %v151_v8, %v43_v5 }
  0x3f   :  { %379 = vst.msk [vmem:[%s882_s1 + $0xd0] sm:$0xff] %vm352_vm0, %v346_v6  ;;  %v287_v18 = vadd.f32 %v255_v9, %v219_v47  ;;  %v348_v17 = vmul.f32 0.0625, %v316_v11 }
  0x40   :  { %380 = vst.msk [vmem:[%s882_s1 + $0xd8] sm:$0xff] %vm352_vm0, %v347_v10  ;;  %v349_v19 = vmul.f32 0.0625, %v317_v12  ;;  %v318_v16 = vadd.f32 %v286_v7, %v222_v13  ;;  %v223_v20 = vadd.f32 %v187_v15, %v115_v14 }
  0x41   :  { %381 = vst.msk [vmem:[%s882_s1 + $0xe0] sm:$0xff] %vm352_vm0, %v348_v17 }
  0x42   :  { %382 = vst.msk [vmem:[%s882_s1 + $0xe8] sm:$0xff] %vm352_vm0, %v349_v19  ;;  %v350_v21 = vmul.f32 0.0625, %v318_v16  ;;  %v319_v22 = vadd.f32 %v287_v18, %v223_v20 }
  0x44   :  { %383 = vst.msk [vmem:[%s882_s1 + $0xf0] sm:$0xff] %vm352_vm0, %v350_v21  ;;  %v351_v23 = vmul.f32 0.0625, %v319_v22 }
  0x46   :  { %384 = vst.msk [vmem:[%s882_s1 + $0xf8] sm:$0xff] %vm352_vm0, %v351_v23 }

</bundles_post_ra>
